<compile_context>
chip_gen: v7x
topology: tpu7x:2x2x1
jax: 0.10.0
libtpu: 0.0.40
codegen_flags: <defaults>
</compile_context>

<pallas_src>
import functools
import numpy as np

import jax
import jax.numpy as jnp
from jax.experimental import pallas as pl
from jax.experimental.pallas import tpu as pltpu


_MAX_CB = 32  # cap on channels per grid step (bounds the static unroll of the W-pass)


def _cdiv(a, b):
    return -(-a // b)


# ---------------------------------------------------------------------------
# Filter construction (mirrors get_filter in the PyTorch code)
# ---------------------------------------------------------------------------
_BINOMIAL = {
    1: [1.0],
    2: [1.0, 1.0],
    3: [1.0, 2.0, 1.0],
    4: [1.0, 3.0, 3.0, 1.0],
    5: [1.0, 4.0, 6.0, 4.0, 1.0],
    6: [1.0, 5.0, 10.0, 10.0, 5.0, 1.0],
    7: [1.0, 6.0, 15.0, 20.0, 15.0, 6.0, 1.0],
}

_PAD_MODE = {"reflect": "reflect", "refl": "reflect",
             "repl": "edge", "replicate": "edge",
             "zero": "constant"}


def _filter_1d(filt_size):
    a = np.asarray(_BINOMIAL[filt_size], dtype=np.float64)
    return (a / a.sum()).astype(np.float32)          # normalized separable 1-D taps


def get_filter(filt_size=3):
    a = np.asarray(_BINOMIAL[filt_size], dtype=np.float64)
    filt = a[:, None] * a[None, :]
    filt = filt / filt.sum()
    return jnp.asarray(filt, dtype=jnp.float32)      # (K, K) 2-D filter (reference)


def _blur_decimate_matrix(width, width_out, taps, stride, pad_lo, reflect):
    """(width, width_out) matrix: 1-D blur along W fused with the stride-S column
    decimation, applied as one small VMEM-resident matmul so no lane-strided
    loads are needed.  With reflect=True the ReflectionPad2d boundary columns
    are baked into the matrix."""
    d = np.zeros((width, width_out), np.float32)
    for wo in range(width_out):
        for j, t in enumerate(taps):
            w = stride * wo - pad_lo + j
            if reflect:
                if w < 0:
                    w = -w
                if w >= width:
                    w = 2 * (width - 1) - w
            d[w, wo] += float(t)
    return jnp.asarray(d)


# ---------------------------------------------------------------------------
# Tile-size selection (VMEM-aware: v7x has 64 MiB physical / 32 MiB scoped,
# v5e's scoped default is only 16 MiB)
# ---------------------------------------------------------------------------
def _choose_tiles_fused(nc, ho, w, wo, itemsize, max_ro=None):
    budget = 10 * 1024 * 1024
    ro_cap = 128 if max_ro is None else max_ro
    ro = max(1, min(ho, ro_cap))
    if ro >= 8:
        ro -= ro % 8
    d_bytes = 2 * (w * wo * 4)

    def step_bytes(cb, ro_):
        rb = 2 * ro_
        bufs = 2 * (cb * rb * w + cb * ro_ * wo) * itemsize   # double-buffered in/out
        temps = 4 * cb * ro_ * w * 4                          # f32 H-pass temporaries
        carry = cb * w * itemsize
        return bufs + temps + carry + d_bytes

    cb = 1
    while cb < min(nc, _MAX_CB) and step_bytes(cb + 1, ro) <= budget:
        cb += 1
    while ro > 8 and step_bytes(cb, ro) > budget:
        ro -= 8
    # give megacore (2 TensorCores on v7x) at least two channel blocks to split
    if nc >= 2 and _cdiv(nc, cb) < 2:
        cb = _cdiv(nc, 2)
    return cb, ro


def _choose_cb_general(nc, hp, wp, ho, wo, itemsize):
    budget = 10 * 1024 * 1024
    per_c = 2 * (hp * wp + ho * wo) * itemsize + 3 * ho * wp * 4
    cb = max(1, min(nc, _MAX_CB, budget // max(per_c, 1)))
    if nc >= 2 and _cdiv(nc, cb) < 2:
        cb = _cdiv(nc, 2)
    return cb


# ---------------------------------------------------------------------------
# Fused kernel: default config (filt_size=3, stride=2, reflect, pad_off=0)
# ---------------------------------------------------------------------------
def _downsample_k3s2_kernel(x_ref, d_ref, o_ref, carry_ref, *, ro):
    # x_ref:     (CB, 2*ro, W)  input rows [t*2*ro, (t+1)*2*ro) of CB channels
    # d_ref:     (W, WO) f32    horizontal [1,2,1]/4 blur + stride-2 decimation
    # o_ref:     (CB, ro, WO)   output rows [t*ro, (t+1)*ro)
    # carry_ref: (CB, 1, W)     row just above this tile (reflect-pad halo),
    #                           carried across row tiles in VMEM scratch.
    rb = 2 * ro

    @pl.when(pl.program_id(1) == 0)
    def _():
        # ReflectionPad2d: the padded row above the image is row +1.
        carry_ref[...] = x_ref[:, 1:2, :]

    even = x_ref[:, pl.ds(0, ro, stride=2), :].astype(jnp.float32)   # rows 0,2,4,...
    odd = x_ref[:, pl.ds(1, ro, stride=2), :].astype(jnp.float32)    # rows 1,3,5,...
    up = carry_ref[...].astype(jnp.float32)                          # (CB, 1, W)
    if ro > 1:
        up = jnp.concatenate([up, odd[:, :ro - 1, :]], axis=1)       # rows -1,1,3,...
    # vertical [1,2,1]/4 blur fused with the stride-2 row decimation
    # (single fused expression -> no K*K VMEM read-modify-write passes)
    hb = 0.25 * (up + odd) + 0.5 * even                              # (CB, ro, W) f32

    # horizontal blur + decimation as one small matmul per channel slice
    dmat = d_ref[...]
    for c in range(o_ref.shape[0]):                                  # static unroll
        o_ref[c] = jnp.dot(hb[c], dmat,
                           preferred_element_type=jnp.float32).astype(o_ref.dtype)

    # carry this tile's last input row as the halo of the next row tile
    carry_ref[...] = x_ref[:, rb - 1:rb, :]


def _downsample_fused(x, max_rows_per_tile=None):
    n, c, h, w = x.shape
    nc = n * c
    ho = (h - 1) // 2 + 1       # == h // 2 on this path (h is even)
    wo = (w - 1) // 2 + 1
    x3 = x.reshape(nc, h, w)    # free reshape: W stays on the lane axis

    taps = _filter_1d(3)
    dmat = _blur_decimate_matrix(w, wo, taps, stride=2, pad_lo=1, reflect=True)

    cb, ro = _choose_tiles_fused(nc, ho, w, wo, x.dtype.itemsize, max_rows_per_tile)
    rb = 2 * ro
    grid = (_cdiv(nc, cb), _cdiv(ho, ro))

    out = pl.pallas_call(
        functools.partial(_downsample_k3s2_kernel, ro=ro),
        out_shape=jax.ShapeDtypeStruct((nc, ho, wo), x.dtype),
        grid=grid,
        in_specs=[
            pl.BlockSpec((cb, rb, w), lambda ci, ti: (ci, ti, 0)),
            pl.BlockSpec((w, wo), lambda ci, ti: (0, 0)),
        ],
        out_specs=pl.BlockSpec((cb, ro, wo), lambda ci, ti: (ci, ti, 0)),
        scratch_shapes=[pltpu.VMEM((cb, 1, w), x.dtype)],
        compiler_params=pltpu.CompilerParams(
            # channel blocks are independent (megacore-splittable); the row-tile
            # axis carries the reflect-pad halo in scratch -> arbitrary.
            dimension_semantics=("parallel", "arbitrary"),
            vmem_limit_bytes=32 * 1024 * 1024,
        ),
    )(x3, dmat)
    return out.reshape(n, c, ho, wo)


# ---------------------------------------------------------------------------
# General fallback (any filt_size / stride / pad_off / pad_type)
# ---------------------------------------------------------------------------
def _downsample_general_kernel(x_ref, d_ref, o_ref, *, taps, stride, ho):
    # x_ref: (CB, Hp, Wp) pre-padded input; d_ref: (Wp, WO); o_ref: (CB, HO, WO)
    def row_slice(i):
        return pl.ds(i, ho) if stride == 1 else pl.ds(i, ho, stride=stride)

    hb = taps[0] * x_ref[:, row_slice(0), :].astype(jnp.float32)
    for i in range(1, len(taps)):
        hb = hb + taps[i] * x_ref[:, row_slice(i), :].astype(jnp.float32)
    dmat = d_ref[...]
    for c in range(o_ref.shape[0]):
        o_ref[c] = jnp.dot(hb[c], dmat,
                           preferred_element_type=jnp.float32).astype(o_ref.dtype)


def _downsample_general(x, filt_size, stride, pad_off, pad_type):
    n, c, h, w = x.shape
    nc = n * c
    k, s = filt_size, stride
    pad_lo = (k - 1) // 2 + pad_off
    pad_hi = int(np.ceil((k - 1) / 2.0)) + pad_off
    mode = _PAD_MODE[pad_type]
    # TODO(synk): this fallback (non-default filt_size/stride/pad) still pays one
    # wrapper-side pad pass and stages whole padded images per channel block;
    # only the default (3x3, stride-2, reflect) path is fully fused/row-tiled.
    xp = jnp.pad(x.reshape(nc, h, w),
                 ((0, 0), (pad_lo, pad_hi), (pad_lo, pad_hi)), mode=mode)
    hp, wp = xp.shape[1], xp.shape[2]
    ho = (hp - k) // s + 1
    wo = (wp - k) // s + 1

    taps = _filter_1d(k)
    dmat = _blur_decimate_matrix(wp, wo, taps, stride=s, pad_lo=0, reflect=False)

    cb = _choose_cb_general(nc, hp, wp, ho, wo, x.dtype.itemsize)
    grid = (_cdiv(nc, cb),)

    out = pl.pallas_call(
        functools.partial(_downsample_general_kernel,
                          taps=tuple(float(t) for t in taps), stride=s, ho=ho),
        out_shape=jax.ShapeDtypeStruct((nc, ho, wo), x.dtype),
        grid=grid,
        in_specs=[
            pl.BlockSpec((cb, hp, wp), lambda ci: (ci, 0, 0)),
            pl.BlockSpec((wp, wo), lambda ci: (0, 0)),
        ],
        out_specs=pl.BlockSpec((cb, ho, wo), lambda ci: (ci, 0, 0)),
        compiler_params=pltpu.CompilerParams(
            dimension_semantics=("parallel",),
            vmem_limit_bytes=32 * 1024 * 1024,
        ),
    )(xp, dmat)
    return out.reshape(n, c, ho, wo)


# ---------------------------------------------------------------------------
# Public entry point (replicates Downsample.forward, NCHW input)
# ---------------------------------------------------------------------------
def downsample(x, *, filt_size=3, stride=2, pad_off=0, pad_type="reflect",
               _max_rows_per_tile=None):
    n, c, h, w = x.shape
    if filt_size == 1:
        # TODO(synk): filt_size==1 is a pure strided slice (no compute); left to XLA.
        if pad_off == 0:
            return x[:, :, ::stride, ::stride]
        xp = jnp.pad(x, ((0, 0), (0, 0), (pad_off, pad_off), (pad_off, pad_off)),
                     mode=_PAD_MODE[pad_type])
        return xp[:, :, ::stride, ::stride]
    if (filt_size == 3 and stride == 2 and pad_off == 0
            and pad_type in ("reflect", "refl") and h % 2 == 0 and h >= 2 and w >= 2):
        return _downsample_fused(x, _max_rows_per_tile)
    return _downsample_general(x, filt_size, stride, pad_off, pad_type)


# ---------------------------------------------------------------------------
# Pure-JAX reference (depthwise conv) for verification
# ---------------------------------------------------------------------------
def downsample_ref(x, *, filt_size=3, stride=2, pad_off=0, pad_type="reflect"):
    n, c, h, w = x.shape
    pad_lo = (filt_size - 1) // 2 + pad_off
    pad_hi = int(np.ceil((filt_size - 1) / 2.0)) + pad_off
    mode = _PAD_MODE[pad_type]
    if filt_size == 1:
        xp = x if pad_off == 0 else jnp.pad(
            x, ((0, 0), (0, 0), (pad_lo, pad_hi), (pad_lo, pad_hi)), mode=mode)
        return xp[:, :, ::stride, ::stride]
    xp = jnp.pad(x, ((0, 0), (0, 0), (pad_lo, pad_hi), (pad_lo, pad_hi)), mode=mode)
    filt = get_filter(filt_size)
    wgt = jnp.broadcast_to(filt[None, None], (c, 1, filt_size, filt_size))
    return jax.lax.conv_general_dilated(
        xp, wgt, (stride, stride), "VALID",
        dimension_numbers=("NCHW", "OIHW", "NCHW"),
        feature_group_count=c)


if __name__ == "__main__":
    key = jax.random.PRNGKey(0)

    # default Downsample config on the canonical small test shape (NCHW)
    x = jax.random.normal(key, (2, 4, 16, 16), dtype=jnp.float32)
    out = jax.block_until_ready(downsample(x))
    assert out.shape == (2, 4, 8, 8), out.shape
    np.testing.assert_allclose(np.asarray(out), np.asarray(downsample_ref(x)),
                               rtol=1e-5, atol=1e-5)

    # multi row-tile case: exercises the carried reflect halo plus ragged
    # channel / row blocks (NC=5 with CB=3, HO=20 with 8-row tiles)
    x2 = jax.random.normal(jax.random.PRNGKey(1), (1, 5, 40, 56), dtype=jnp.float32)
    out2 = jax.block_until_ready(downsample(x2, _max_rows_per_tile=8))
    np.testing.assert_allclose(np.asarray(out2), np.asarray(downsample_ref(x2)),
                               rtol=1e-5, atol=1e-5)

    # non-default config -> general (pre-padded) fallback kernel
    x3 = jax.random.normal(jax.random.PRNGKey(2), (1, 3, 10, 12), dtype=jnp.float32)
    out3 = jax.block_until_ready(downsample(x3, filt_size=5))
    np.testing.assert_allclose(np.asarray(out3),
                               np.asarray(downsample_ref(x3, filt_size=5)),
                               rtol=1e-5, atol=1e-5)

    print("KERNEL_OK")
</pallas_src>

<mosaic_0001>
module attributes {stable_mosaic.version = 11 : i64} {
  func.func @_downsample_k3s2_kernel(%arg0: i32, %arg1: i32, %arg2: memref<4x16x16xf32, #tpu.memory_space<vmem>>, %arg3: memref<16x8xf32, #tpu.memory_space<vmem>>, %arg4: memref<4x8x8xf32, #tpu.memory_space<vmem>>, %arg5: memref<4x1x16xf32, #tpu.memory_space<vmem>>) attributes {dimension_semantics = [#tpu.dimension_semantics<parallel>, #tpu.dimension_semantics<arbitrary>], iteration_bounds = array<i64: 2, 1>, scalar_prefetch = 0 : i64, scratch_operands = 1 : i64, tpu.core_type = #tpu.core_type<tc>, window_params = [{transform_indices = @transform_0, window_bounds = array<i64: 4, 16, 16>}, {pipeline_mode = #tpu.pipeline_mode<synchronous>, transform_indices = @transform_1, window_bounds = array<i64: 16, 8>}, {transform_indices = @transform_2, window_bounds = array<i64: 4, 8, 8>}]} {
    %c0_i32 = arith.constant 0 : i32
    %0 = arith.cmpi eq, %arg1, %c0_i32 : i32
    %1 = arith.extui %0 : i1 to i32
    %c0_i32_0 = arith.constant 0 : i32
    %2 = arith.cmpi ne, %1, %c0_i32_0 : i32
    scf.if %2 {
      %c0_30 = arith.constant 0 : index
      %c1_31 = arith.constant 1 : index
      %c0_32 = arith.constant 0 : index
      %41 = vector.load %arg2[%c0_30, %c1_31, %c0_32] : memref<4x16x16xf32, #tpu.memory_space<vmem>>, vector<4x1x16xf32>
      %c0_33 = arith.constant 0 : index
      %c0_34 = arith.constant 0 : index
      %c0_35 = arith.constant 0 : index
      %42 = vector.load %arg5[%c0_33, %c0_34, %c0_35] : memref<4x1x16xf32, #tpu.memory_space<vmem>>, vector<4x1x16xf32>
      tpu.vector_store %arg5[%c0_33, %c0_34, %c0_35], %41 {strides = array<i32>} : memref<4x1x16xf32, #tpu.memory_space<vmem>>, vector<4x1x16xf32>,
    } else {
    }
    %c0 = arith.constant 0 : index
    %c0_1 = arith.constant 0 : index
    %c0_2 = arith.constant 0 : index
    %3 = tpu.strided_load %arg2[%c0, %c0_1, %c0_2] {strides = array<i32: 1, 2, 1>} : memref<4x16x16xf32, #tpu.memory_space<vmem>>, vector<4x8x16xf32>
    %c0_3 = arith.constant 0 : index
    %c1 = arith.constant 1 : index
    %c0_4 = arith.constant 0 : index
    %4 = tpu.strided_load %arg2[%c0_3, %c1, %c0_4] {strides = array<i32: 1, 2, 1>} : memref<4x16x16xf32, #tpu.memory_space<vmem>>, vector<4x8x16xf32>
    %c0_5 = arith.constant 0 : index
    %c0_6 = arith.constant 0 : index
    %c0_7 = arith.constant 0 : index
    %5 = vector.load %arg5[%c0_5, %c0_6, %c0_7] : memref<4x1x16xf32, #tpu.memory_space<vmem>>, vector<4x1x16xf32>
    %6 = vector.extract_strided_slice %4 {offsets = [0, 0, 0], sizes = [4, 7, 16], strides = [1, 1, 1]} : vector<4x8x16xf32> to vector<4x7x16xf32>
    %7 = tpu.concatenate %5, %6 in 1 : vector<4x1x16xf32>, vector<4x7x16xf32> -> vector<4x8x16xf32>
    %8 = arith.addf %7, %4 : vector<4x8x16xf32>
    %cst = arith.constant 2.500000e-01 : f32
    %9 = vector.broadcast %cst : f32 to vector<4x8x16xf32>
    %10 = arith.mulf %9, %8 : vector<4x8x16xf32>
    %cst_8 = arith.constant 5.000000e-01 : f32
    %11 = vector.broadcast %cst_8 : f32 to vector<4x8x16xf32>
    %12 = arith.mulf %11, %3 : vector<4x8x16xf32>
    %13 = arith.addf %10, %12 : vector<4x8x16xf32>
    %c0_9 = arith.constant 0 : index
    %c0_10 = arith.constant 0 : index
    %14 = vector.load %arg3[%c0_9, %c0_10] : memref<16x8xf32, #tpu.memory_space<vmem>>, vector<16x8xf32>
    %15 = vector.extract_strided_slice %13 {offsets = [0, 0, 0], sizes = [1, 8, 16], strides = [1, 1, 1]} : vector<4x8x16xf32> to vector<1x8x16xf32>
    %16 = vector.shape_cast %15 : vector<1x8x16xf32> to vector<8x16xf32>
    %cst_11 = arith.constant dense<0.000000e+00> : vector<8x8xf32>
    %17 = tpu.matmul %16, %14, %cst_11 {dimension_numbers = #tpu.dot_dimension_numbers<[1], [0], [0], [1], [0, 0, 1, 1], [], []>} : vector<8x16xf32>, vector<16x8xf32>, vector<8x8xf32> -> vector<8x8xf32>
    %c0_12 = arith.constant 0 : index
    %c0_13 = arith.constant 0 : index
    %c0_14 = arith.constant 0 : index
    %18 = vector.load %arg4[%c0_12, %c0_13, %c0_14] : memref<4x8x8xf32, #tpu.memory_space<vmem>>, vector<1x8x8xf32>
    %19 = vector.shape_cast %18 : vector<1x8x8xf32> to vector<8x8xf32>
    %20 = vector.shape_cast %17 : vector<8x8xf32> to vector<1x8x8xf32>
    tpu.vector_store %arg4[%c0_12, %c0_13, %c0_14], %20 {strides = array<i32>} : memref<4x8x8xf32, #tpu.memory_space<vmem>>, vector<1x8x8xf32>,
    %21 = vector.extract_strided_slice %13 {offsets = [1, 0, 0], sizes = [1, 8, 16], strides = [1, 1, 1]} : vector<4x8x16xf32> to vector<1x8x16xf32>
    %22 = vector.shape_cast %21 : vector<1x8x16xf32> to vector<8x16xf32>
    %cst_15 = arith.constant dense<0.000000e+00> : vector<8x8xf32>
    %23 = tpu.matmul %22, %14, %cst_15 {dimension_numbers = #tpu.dot_dimension_numbers<[1], [0], [0], [1], [0, 0, 1, 1], [], []>} : vector<8x16xf32>, vector<16x8xf32>, vector<8x8xf32> -> vector<8x8xf32>
    %c1_16 = arith.constant 1 : index
    %c0_17 = arith.constant 0 : index
    %c0_18 = arith.constant 0 : index
    %24 = vector.load %arg4[%c1_16, %c0_17, %c0_18] : memref<4x8x8xf32, #tpu.memory_space<vmem>>, vector<1x8x8xf32>
    %25 = vector.shape_cast %24 : vector<1x8x8xf32> to vector<8x8xf32>
    %26 = vector.shape_cast %23 : vector<8x8xf32> to vector<1x8x8xf32>
    tpu.vector_store %arg4[%c1_16, %c0_17, %c0_18], %26 {strides = array<i32>} : memref<4x8x8xf32, #tpu.memory_space<vmem>>, vector<1x8x8xf32>,
    %27 = vector.extract_strided_slice %13 {offsets = [2, 0, 0], sizes = [1, 8, 16], strides = [1, 1, 1]} : vector<4x8x16xf32> to vector<1x8x16xf32>
    %28 = vector.shape_cast %27 : vector<1x8x16xf32> to vector<8x16xf32>
    %cst_19 = arith.constant dense<0.000000e+00> : vector<8x8xf32>
    %29 = tpu.matmul %28, %14, %cst_19 {dimension_numbers = #tpu.dot_dimension_numbers<[1], [0], [0], [1], [0, 0, 1, 1], [], []>} : vector<8x16xf32>, vector<16x8xf32>, vector<8x8xf32> -> vector<8x8xf32>
    %c2 = arith.constant 2 : index
    %c0_20 = arith.constant 0 : index
    %c0_21 = arith.constant 0 : index
    %30 = vector.load %arg4[%c2, %c0_20, %c0_21] : memref<4x8x8xf32, #tpu.memory_space<vmem>>, vector<1x8x8xf32>
    %31 = vector.shape_cast %30 : vector<1x8x8xf32> to vector<8x8xf32>
    %32 = vector.shape_cast %29 : vector<8x8xf32> to vector<1x8x8xf32>
    tpu.vector_store %arg4[%c2, %c0_20, %c0_21], %32 {strides = array<i32>} : memref<4x8x8xf32, #tpu.memory_space<vmem>>, vector<1x8x8xf32>,
    %33 = vector.extract_strided_slice %13 {offsets = [3, 0, 0], sizes = [1, 8, 16], strides = [1, 1, 1]} : vector<4x8x16xf32> to vector<1x8x16xf32>
    %34 = vector.shape_cast %33 : vector<1x8x16xf32> to vector<8x16xf32>
    %cst_22 = arith.constant dense<0.000000e+00> : vector<8x8xf32>
    %35 = tpu.matmul %34, %14, %cst_22 {dimension_numbers = #tpu.dot_dimension_numbers<[1], [0], [0], [1], [0, 0, 1, 1], [], []>} : vector<8x16xf32>, vector<16x8xf32>, vector<8x8xf32> -> vector<8x8xf32>
    %c3 = arith.constant 3 : index
    %c0_23 = arith.constant 0 : index
    %c0_24 = arith.constant 0 : index
    %36 = vector.load %arg4[%c3, %c0_23, %c0_24] : memref<4x8x8xf32, #tpu.memory_space<vmem>>, vector<1x8x8xf32>
    %37 = vector.shape_cast %36 : vector<1x8x8xf32> to vector<8x8xf32>
    %38 = vector.shape_cast %35 : vector<8x8xf32> to vector<1x8x8xf32>
    tpu.vector_store %arg4[%c3, %c0_23, %c0_24], %38 {strides = array<i32>} : memref<4x8x8xf32, #tpu.memory_space<vmem>>, vector<1x8x8xf32>,
    %c0_25 = arith.constant 0 : index
    %c15 = arith.constant 15 : index
    %c0_26 = arith.constant 0 : index
    %39 = vector.load %arg2[%c0_25, %c15, %c0_26] : memref<4x16x16xf32, #tpu.memory_space<vmem>>, vector<4x1x16xf32>
    %c0_27 = arith.constant 0 : index
    %c0_28 = arith.constant 0 : index
    %c0_29 = arith.constant 0 : index
    %40 = vector.load %arg5[%c0_27, %c0_28, %c0_29] : memref<4x1x16xf32, #tpu.memory_space<vmem>>, vector<4x1x16xf32>
    tpu.vector_store %arg5[%c0_27, %c0_28, %c0_29], %39 {strides = array<i32>} : memref<4x1x16xf32, #tpu.memory_space<vmem>>, vector<4x1x16xf32>,
    return
  }
  func.func @transform_0(%arg0: i32, %arg1: i32) -> (i32, i32, i32) {
    %c0_i32 = arith.constant 0 : i32
    %c0_i32_0 = arith.constant 0 : i32
    return %arg0, %arg1, %c0_i32 : i32, i32, i32
  }
  func.func @transform_1(%arg0: i32, %arg1: i32) -> (i32, i32) {
    %c0_i32 = arith.constant 0 : i32
    %c0_i32_0 = arith.constant 0 : i32
    %c0_i32_1 = arith.constant 0 : i32
    return %c0_i32, %c0_i32_0 : i32, i32
  }
  func.func @transform_2(%arg0: i32, %arg1: i32) -> (i32, i32, i32) {
    %c0_i32 = arith.constant 0 : i32
    %c0_i32_0 = arith.constant 0 : i32
    return %arg0, %arg1, %c0_i32 : i32, i32, i32
  }
}

</mosaic_0001>

<bundles_post_ra>
// kernel: tpu_custom_call.1
= control target key start
LH: loop header
LB: loop body
LE: loop exit
PB: predicated region body
PF: predicated region fallthrough
CT: control target
= control target key end

     0   :  { %7 = vsyncpa [#allocation4], 0  ;;  %s1182_s0 = inlined_call_operand.hbm [shape: f32[8,16,16], index: 0, kind: input, shape index: {}]   ;;  %s1183_s1 = inlined_call_operand.vmem [shape: f32[16,8], index: 1, kind: input, shape index: {}]   ;;  %s1184_s2 = inlined_call_operand.hbm [shape: f32[8,8,8], index: 2, kind: output, shape index: {}]  }
   0x1   :  { %9 = vsyncpa [#allocation4 + $0x1], 0 }
   0x2   :  { %10 = vsyncpa [#allocation5], 0 }
   0x3   :  { %12 = vsyncpa [#allocation5 + $0x1], 0  ;;  %s954_s9 = smov 0   ;;  %s956_s10 = smov 0  }
   0x4   :  { %s958_s11 = smov 0   ;;  %s960_s12 = smov 0  }
   0x5   :  { %s962_s13 = smov 0   ;;  %s964_s14 = smov 0  }
   0x6 LB: > { %s662_s15 = sadd.s32 4294967295, %s928_s14   ;;  %s663_s16 = sadd.s32 4294967294, %s928_s14   ;;  %s928_s14 = sphi %s964_s14, %s18_s14   ;;  %s924_s13 = sphi %s962_s13, %s1199_s13   ;;  %s920_s12 = sphi %s960_s12, %s1198_s12   ;;  %s916_s11 = sphi %s958_s11, %s1197_s11   ;;  %s912_s10 = sphi %s956_s10, %s1196_s10   ;;  %s908_s9 = sphi %s954_s9, %s1195_s9  }
   0x7   : > { %s30_s17 = sadd.s32 1, %s924_s13  ;;  %s39_s18 = sadd.s32 1, %s916_s11 }
   0x8   : > { %p32_p0 = scmp.ge.s32.totalorder %s30_s17, 2  ;;  %p46_p1 = scmp.ne.s32.totalorder %s916_s11, %s912_s10 }
   0x9   : > { %p47_p2 = scmp.eq.s32.totalorder %s928_s14, 0  ;;  %p52_p3 = scmp.ne.s32.totalorder %s912_s10, %s908_s9 }
   0xa   : > { %s1201_s17 = smov (%p32_p0, %s30_s17), 0  ;;  %p53_p5 = scmp.eq.s32.totalorder %s662_s15, 0 }
   0xb   : > { %p995_p4 = por %p47_p2, %p46_p1  ;;  %s34_s20 = ssub.s32 %s924_s13, %s1201_s17 }
   0xc   : > { %p99_p6 = scmp.eq.s32.totalorder %s662_s15, 1  ;;  %p37_p7 = scmp.eq.s32.totalorder %s34_s20, 0 }
   0xd   : > { %p1001_p8 = por %p53_p5, %p52_p3  ;;  %p105_p10 = scmp.eq.s32.totalorder %s663_s16, 1 }
   0xe   : > { %p1005_p9 = por %p99_p6, %p46_p1  ;;  %p759_p13 = scmp.lt.s32.totalorder %s928_s14, 2 }
   0xf   : > { %s1010_s23 = scalar_select %p37_p7, %s916_s11, %s39_s18  }
  0x10   : > { %s1188_s22 = scalar_select %p1005_p9, 1, 0 }
  0x11   : > { %p1012_p11 = por %p105_p10, %p52_p3  ;;  %s128_s25 = sand.u32 1, %s916_s11  }
  0x12   : > { %s666_s26 = sshll.u32 %s128_s25, 6  ;;  %s693_s27 = sshll.u32 %s924_s13, 10 }
  0x13   : > { %s1189_s24 = scalar_select %p1012_p11, 1, 0 }
  0x14   : > { %s1023_s30 = scalar_lea.hbm %s1182_s0, %s693_s27  ;;  %s132_s3 = scalar_lea.vmem [#allocation3], %s666_s26 }
  0x15   : > { %s142_s4 = sshll.u32 %s132_s3, 4  ;;  %p1029_p0 = pnand %p759_p13, %p995_p4  ;;  %s1025_s4 = int_to_ptr.vmem [resolvable:$true] %s142_s4 }
  0x16   : > { %s1034_s6 = scalar_lea.sflag [#allocation4], %s128_s25  ;;  %s816_s7 = scalar_lea.hbm %s1023_s30, 1024 }
  0x17   : > { %p817_p2 = scmp.ne.s32.totalorder %s1023_s30, %s816_s7  ;;  %p818_p3 = pneg %p1029_p0 }
  0x18   : > { %s821_s16 = scalar_lea.hbm %s1182_s0, 2048  ;;  %p822_p4 = scmp.lt.u32.totalorder %s1023_s30, %s1182_s0 }
  0x19   : > { %p819_p5 = pnand %p818_p3, %p817_p2  ;;  %p823_p7 = scmp.lt.u32.totalorder %s821_s16, %s816_s7 }
  0x1a   : > { %p825_p13 = scmp.lt.u32.totalorder %s816_s7, %s1023_s30 }
  0x1b   : > { %p820_p6 = pneg %p819_p5  ;;  %p824_p10 = por %p823_p7, %p822_p4 }
  0x1d   : > { %p826_p12 = por %p825_p13, %p824_p10 }
  0x1f   : > { %p827_p1 = pnand %p826_p12, %p820_p6 }
  0x21   : > { %830 = shalt.err (!%p827_p1)
}
  0x22   : > { %s831_s20 = scalar_lea.vmem %s1025_s4, 1024  ;;  %s930_s25 = smov [#allocation3]  }
  0x23   : > { %p832_p2 = scmp.ne.s32.totalorder %s1025_s4, %s831_s20  ;;  %s836_s26 = sshll.u32 %s930_s25, 4  ;;  %s837_s26 = int_to_ptr.vmem [resolvable:$false] %s836_s26 }
  0x24   : > { %s838_s27 = scalar_lea.vmem %s837_s26, 2048  ;;  %p839_p9 = scmp.lt.s32.totalorder %s1025_s4, %s837_s26 }
  0x25   : > { %p834_p5 = pnand %p832_p2, %p818_p3  ;;  %p840_p4 = scmp.lt.s32.totalorder %s838_s27, %s831_s20 }
  0x27   : > { %p835_p11 = pneg %p834_p5  ;;  %p841_p7 = por %p840_p4, %p839_p9 }
  0x29   : > { %p842_p10 = pnand %p841_p7, %p835_p11 }
  0x2b   : > { %845 = shalt.err (!%p842_p10)
}
  0x2c   : > { %s931_s28 = smov 128   ;;  %s932_s29 = smov 8  }
  0x2d   : > { %754 = dma.hbm_to_vmem [thread:$0]  (!%p1029_p0), %s1023_s30, 1024, %s1025_s4, %s1034_s6, %s931_s28, %s931_s28, %s932_s29  }
  0x2e   : > { %p150_p12 = scmp.lt.s32.totalorder %s928_s14, 3  ;;  %p1191_p1 = scmp.ge.s32.totalorder %s928_s14, 1 }
  0x30   : > { %p151_p3 = pnand %p1191_p1, %p150_p12 }
  0x31   : > { %s1066_s3 = sand.u32 (!%p151_p3), 1, %s912_s10  }
  0x32   : > { %154 = sbr.rel (%p151_p3) target bundleno = 307 (0x133), region = 28  ;;  %s671_s7 = sshll.u32 (!%p151_p3), %s1066_s3, 6 }
  0x33   : > { %s157_s8 = scalar_lea.sflag (!%p151_p3), [#allocation4], %s1066_s3  ;;  %s1070_s15 = scalar_lea.vmem (!%p151_p3), [#allocation3], %s671_s7 }
  0x39   : > { %899 = dma.done.wait (%p1001_p8), %s157_s8, 1024  }
  0x3a   : > { %901 = vsyncadd (%p1001_p8), %s157_s8, 4294966272  ;;  %v933_v0 = vmov 0.0|0.0   ;;  %vm934_vm0 = vmmov 0   ;;  %v935_v1 = vmov 0.0   ;;  %vm192_vm1 = vcmask 122880   ;;  %v249_v2 = vld [vmem:[%s1183_s1] sm:$0xff] }
  0x3b   : > { %735 = vmatprep.subr.bf16.mxu0 %v933_v0  ;;  %738 = vmatprep.subr.bf16.mxu1 %v933_v0  ;;  %v250_v3 = vld [vmem:[%s1183_s1 + $0x8] sm:$0xff]  ;;  %v188_v4 = vld [vmem:[%s1070_s15 + $0x1] sm:$0x1]  ;;  %v189_v7 = vld [vmem:[%s1070_s15 + $0x11] sm:$0x1]  ;;  %vm228_vm2 = vcmask 1040384  }
  0x3c   : > { %711 = vmatprep.mubr.msk.f32.mxu0 %vm934_vm0, %v935_v1  ;;  %718 = vmatprep.mubr.msk.f32.mxu1 %vm934_vm0, %v935_v1  ;;  %v736_v5 = vpack.c.bf16 %v250_v3, %v249_v2  ;;  %193 = vst.msk [vmem:[#allocation2] sm:$0x1] %vm192_vm1, %v188_v4  ;;  %v676_v6 = vld [vmem:[%s1070_s15 + $0x1] ss:$2 sm:$0xff]  ;;  %194 = vst.msk [vmem:[#allocation2 + $0x1] sm:$0x1] %vm192_vm1, %v189_v7 }
  0x3d   : > { %v677_v8 = vld [vmem:[%s1070_s15 + $0x11] ss:$2 sm:$0xff]  ;;  %v190_v9 = vld [vmem:[%s1070_s15 + $0x21] sm:$0x1]  ;;  %v220_v10 = vrot.slane %v676_v6, 7  ;;  %vm251_vm3 = vcmask 130048  }
  0x3e   : > { %737 = vmatpush3.bf16.msra.mxu0 %v736_v5  ;;  %740 = vmatpush3.bf16.msra.mxu1 %v736_v5  ;;  %195 = vst.msk [vmem:[#allocation2 + $0x2] sm:$0x1] %vm192_vm1, %v190_v9  ;;  %v552_v11 = vld [vmem:[%s1070_s15 + $0xf] sm:$0x1]  ;;  %v191_v13 = vld [vmem:[%s1070_s15 + $0x31] sm:$0x1] }
  0x3f   : > { %741 = vmatprep.subr.bf16.mxu0 %v933_v0  ;;  %744 = vmatprep.subr.bf16.mxu1 %v933_v0  ;;  %v678_v12 = vld [vmem:[%s1070_s15 + $0x21] ss:$2 sm:$0xff]  ;;  %v197_v14 = vld [vmem:[%s1070_s15] ss:$2 sm:$0xff]  ;;  %v221_v15 = vrot.slane %v677_v8, 7  ;;  %s672_s6 = sshll.u32 %s1066_s3, 5 }
  0x40   : > { %196 = vst.msk [vmem:[#allocation2 + $0x3] sm:$0x1] %vm192_vm1, %v191_v13  ;;  %v553_v17 = vld [vmem:[%s1070_s15 + $0x1f] sm:$0x1]  ;;  %v673_v20 = vld [vmem:[%s1070_s15 + $0x10] ss:$2 sm:$0xff] }
  0x41   : > { %v679_v18 = vld [vmem:[%s1070_s15 + $0x31] ss:$2 sm:$0xff]  ;;  %v222_v21 = vrot.slane %v678_v12, 7  ;;  %v241_v23 = vmul.f32 0.5, %v197_v14  ;;  %v554_v25 = vld [vmem:[%s1070_s15 + $0x2f] sm:$0x1] }
  0x42   : > { %v674_v27 = vld [vmem:[%s1070_s15 + $0x20] ss:$2 sm:$0xff]  ;;  %v223_v28 = vrot.slane %v679_v18, 7  ;;  %v242_v31 = vmul.f32 0.5, %v673_v20  ;;  %v555_v33 = vld [vmem:[%s1070_s15 + $0x3f] sm:$0x1] }
  0x43   : > { %v212_v16 = vld [vmem:[#allocation2] sm:$0x1]  ;;  %v213_v24 = vld [vmem:[#allocation2 + $0x1] sm:$0x1]  ;;  %v243_v39 = vmul.f32 0.5, %v674_v27  ;;  %vm325_vm4 = vcmask 64512  }
  0x44   : > { %v229_v19 = vsel %vm228_vm2, %v212_v16, %v220_v10  ;;  %557 = vst.msk [vmem:[#allocation2] sm:$0x1] %vm192_vm1, %v552_v11  ;;  %v230_v26 = vsel %vm228_vm2, %v213_v24, %v221_v15  ;;  %558 = vst.msk [vmem:[#allocation2 + $0x1] sm:$0x1] %vm192_vm1, %v553_v17  ;;  %v675_v35 = vld [vmem:[%s1070_s15 + $0x30] ss:$2 sm:$0xff] }
  0x45   : > { %v233_v22 = vadd.f32 %v676_v6, %v229_v19  ;;  %v234_v30 = vadd.f32 %v677_v8, %v230_v26  ;;  %v214_v32 = vld [vmem:[#allocation2 + $0x2] sm:$0x1]  ;;  %v244_v45 = vmul.f32 0.5, %v675_v35  ;;  %s180_s16 = scalar_lea.vmem [#allocation6], %s672_s6  ;;  %s694_s19 = sshll.u32 %s920_s12, 9 }
  0x46   : > { %v231_v34 = vsel %vm228_vm2, %v214_v32, %v222_v21  ;;  %559 = vst.msk [vmem:[#allocation2 + $0x2] sm:$0x1] %vm192_vm1, %v554_v25  ;;  %s576_s18 = sshll.u32 %s180_s16, 4  ;;  %s1131_s26 = scalar_lea.hbm %s1184_s2, %s694_s19  ;;  %s1125_s18 = int_to_ptr.vmem [resolvable:$true] %s576_s18 }
  0x47   : > { %v237_v29 = vmul.f32 0.25, %v233_v22  ;;  %v238_v37 = vmul.f32 0.25, %v234_v30  ;;  %v235_v38 = vadd.f32 %v678_v12, %v231_v34  ;;  %v215_v40 = vld [vmem:[#allocation2 + $0x3] sm:$0x1]  ;;  %s562_s12 = scalar_lea.sflag [#allocation5], %s1066_s3  ;;  %s846_s27 = scalar_lea.vmem %s1125_s18, 512 }
  0x48   : > { %v232_v41 = vsel %vm228_vm2, %v215_v40, %v223_v28  ;;  %560 = vst.msk [vmem:[#allocation2 + $0x3] sm:$0x1] %vm192_vm1, %v555_v33  ;;  %p847_p8 = scmp.ne.s32.totalorder %s1125_s18, %s846_s27  ;;  %p1192_p9 = scmp.ne.s32.totalorder %s1188_s22, 0 }
  0x49   : > { %v245_v36 = vadd.f32 %v241_v23, %v237_v29  ;;  %v246_v42 = vadd.f32 %v242_v31, %v238_v37  ;;  %v239_v43 = vmul.f32 0.25, %v235_v38  ;;  %v236_v44 = vadd.f32 %v679_v18, %v232_v41  ;;  %s936_s28 = smov [#allocation6]  }
  0x4a   : > { %p848_p11 = pnand %p847_p8, %p1192_p9  ;;  %s850_s29 = sshll.u32 %s936_s28, 4  ;;  %s851_s29 = int_to_ptr.vmem [resolvable:$false] %s850_s29 }
  0x4b   : > { %712 = vmatmul.mubr.msk.f32.vlgmr.msra.gmra.mrb[0].mxu0 %vm251_vm3, %v245_v36  ;;  %719 = vmatmul.mubr.msk.f32.vlgmr.msra.gmra.mrb[0].mxu1 %vm251_vm3, %v246_v42  ;;  %v247_v46 = vadd.f32 %v243_v39, %v239_v43  ;;  %v240_v47 = vmul.f32 0.25, %v236_v44  ;;  %s852_s7 = scalar_lea.vmem %s851_s29, 1024  ;;  %p853_p6 = scmp.lt.s32.totalorder %s1125_s18, %s851_s29 }
  0x4c   : > { %743 = vmatpush3.bf16.msra.mxu0 %v736_v5  ;;  %725 = vmatprep.mubr.msk.f32.mxu0 %vm934_vm0, %v935_v1  ;;  %p849_p0 = pneg %p848_p11  ;;  %p854_p13 = scmp.lt.s32.totalorder %s852_s7, %s846_s27 }
  0x4d   : > { %746 = vmatpush3.bf16.msra.mxu1 %v736_v5  ;;  %732 = vmatprep.mubr.msk.f32.mxu1 %vm934_vm0, %v935_v1  ;;  %v248_v48 = vadd.f32 %v244_v45, %v240_v47 }
  0x4e   : > { %p855_p2 = por %p854_p13, %p853_p6 }
  0x4f   : > { %726 = vmatmul.mubr.msk.f32.vlgmr.msra.gmra.mrb[2].mxu0 %vm251_vm3, %v247_v46 }
  0x50   : > { %733 = vmatmul.mubr.msk.f32.vlgmr.msra.gmra.mrb[2].mxu1 %vm251_vm3, %v248_v48  ;;  %p856_p5 = pnand %p855_p2, %p849_p0 }
 0x11e   : > { %v321_v49 = vpop.f32.mrb[0].mxu0  ;;  %v396_v51 = vpop.f32.mrb[0].mxu1 }
 0x11f   : > { %326 = vst.msk [vmem:[%s180_s16] sm:$0xff] %vm325_vm4, %v321_v49  ;;  %v713_v50 = vpop.f32.mrb[1].mxu0  ;;  %682 = vst.msk [vmem:[%s180_s16 + $0x8] sm:$0xff] %vm325_vm4, %v396_v51  ;;  %v720_v52 = vpop.f32.mrb[1].mxu1 }
 0x122   : > { %v471_v53 = vpop.f32.mrb[2].mxu0 }
 0x123   : > { %684 = vst.msk [vmem:[%s180_s16 + $0x10] sm:$0xff] %vm325_vm4, %v471_v53  ;;  %v727_v54 = vpop.f32.mrb[3].mxu0  ;;  %v546_v55 = vpop.f32.mrb[2].mxu1 }
 0x124   : > { %686 = vst.msk [vmem:[%s180_s16 + $0x18] sm:$0xff] %vm325_vm4, %v546_v55  ;;  %v734_v56 = vpop.f32.mrb[3].mxu1 }
 0x125   : > { %859 = shalt.err (!%p856_p5)
}
 0x126   : > { %s860_s8 = scalar_lea.hbm %s1131_s26, 512  ;;  %s864_s21 = scalar_lea.hbm %s1184_s2, 1024 }
 0x127   : > { %p861_p4 = scmp.ne.s32.totalorder %s1131_s26, %s860_s8  ;;  %p865_p12 = scmp.lt.u32.totalorder %s1131_s26, %s1184_s2 }
 0x128   : > { %p866_p1 = scmp.lt.u32.totalorder %s864_s21, %s860_s8  ;;  %p868_p8 = scmp.lt.u32.totalorder %s860_s8, %s1131_s26 }
 0x129   : > { %p862_p7 = pnand %p861_p4, %p1192_p9 }
 0x12a   : > { %p867_p3 = por %p866_p1, %p865_p12 }
 0x12b   : > { %p863_p10 = pneg %p862_p7 }
 0x12c   : > { %p869_p11 = por %p868_p8, %p867_p3 }
 0x12e   : > { %p870_p0 = pnand %p869_p11, %p863_p10 }
 0x130   : > { %873 = shalt.err (!%p870_p0)
}
 0x131   : > { %s937_s6 = smov 128   ;;  %s938_s16 = smov 8  }
 0x132   : > { %749 = dma.vmem_to_hbm [thread:$0]  (%p1192_p9), %s1125_s18, 512, %s1131_s26, %s562_s12, %s937_s6, %s937_s6, %s938_s16  }
 0x133 PF: > { %s591_s19 = sand.u32 1, %s908_s9   ;;  %p1193_p6 = scmp.ne.s32.totalorder %s1189_s24, 0 }
 0x134   : > { %p1194_p13 = scmp.ge.s32.totalorder %s928_s14, 2  ;;  %s592_s20 = scalar_lea.sflag [#allocation5], %s591_s19 }
 0x136   : > { %p756_p2 = pnand %p1194_p13, %p1193_p6 }
 0x138   : > { %903 = dma.done.wait (!%p756_p2), %s592_s20, 512  }
 0x139   : > { %905 = vsyncadd (!%p756_p2), %s592_s20, 4294966784  ;;  %s18_s14 = sadd.s32 1, %s928_s14   ;;  %s1195_s9 = smov %s912_s10 }
 0x13a   : > { %p15_p5 = scmp.ge.s32.totalorder %s18_s14, 4   ;;  %s1196_s10 = smov %s916_s11 }
 0x13b   : > { %s1197_s11 = smov %s1010_s23  ;;  %s1198_s12 = smov %s924_s13 }
 0x13c   : > { %s1199_s13 = smov %s1201_s17  ;;  %17 = sbr.rel (!%p15_p5) target bundleno = 6 (0x6), region = 87 }
 0x143   :  { %597 = vsyncpa [#allocation4], 1 }
 0x144   :  { %599 = vsyncpa [#allocation4 + $0x1], 1 }
 0x145   :  { %600 = vsyncpa [#allocation5], 1 }
 0x146   :  { %602 = vsyncpa [#allocation5 + $0x1], 1 }

</bundles_post_ra>
